<compile_context>
chip_gen: v7x
topology: tpu7x:2x2x1
jax: 0.10.0
libtpu: 0.0.40
codegen_flags: <defaults>
</compile_context>

<pallas_src>
import functools

import jax
import jax.numpy as jnp
from jax.experimental import pallas as pl
from jax.experimental.pallas import tpu as pltpu


def _round_up(x: int, m: int) -> int:
    return (x + m - 1) // m * m


def _fused_mlp_kernel(*refs, num_layers: int, mxu_dtype):
    """refs = (x_ref, w_0..w_{L-1}, b_0..b_{L-1}, o_ref).

    x_ref: (tm, K0)   w_i: (K_i, N_i)   b_i: (1, N_i) f32   o_ref: (tm, N_last)
    """
    x_ref = refs[0]
    w_refs = refs[1:1 + num_layers]
    b_refs = refs[1 + num_layers:1 + 2 * num_layers]
    o_ref = refs[1 + 2 * num_layers]

    # Activation stays in f32 vregs between layers; only the MXU inputs are
    # cast to mxu_dtype (no-op if weights are already stored in that dtype).
    h = x_ref[...].astype(jnp.float32)
    for i in range(num_layers):
        a = h.astype(mxu_dtype)
        w = w_refs[i][...].astype(mxu_dtype)
        acc = jnp.dot(a, w, preferred_element_type=jnp.float32)
        acc = acc + b_refs[i][...].astype(jnp.float32)   # (1, N) broadcast
        if i < num_layers - 1:
            acc = jnp.maximum(acc, 0.0)                  # f32 ReLU epilogue
        h = acc
    o_ref[...] = h.astype(o_ref.dtype)                   # single final cast


def prepare_mlp_params(weights, biases, mxu_dtype=jnp.bfloat16):
    """One-time parameter prep (do this at init, NOT per forward call).

    weights[i]: (in_i, out_i)  ->  cast to mxu_dtype for the MXU.
    biases[i]:  (out_i,)       ->  (1, out_i) in f32 for the f32 epilogue.
    """
    w_p = [jnp.asarray(w, dtype=mxu_dtype) for w in weights]
    b_p = [jnp.asarray(b, dtype=jnp.float32).reshape(1, -1) for b in biases]
    return w_p, b_p


def mlp_forward(x, weights, biases, *, tm_max: int = 512,
                mxu_dtype=jnp.bfloat16):
    """Fused Pallas MLP: x (..., input_dim) -> (..., output_dim).

    weights[i]: (in_i, out_i) (already transposed vs. torch Linear storage,
    ideally already in `mxu_dtype` via prepare_mlp_params), biases[i]: (1, out_i)
    or (out_i,).  ReLU on all but the last layer.
    """
    num_layers = len(weights)
    lead_shape = x.shape[:-1]
    in_dim = x.shape[-1]
    out_dim = weights[-1].shape[1]

    biases = [jnp.reshape(b, (1, -1)) for b in biases]   # metadata-only

    # Flatten leading dims to rows; ragged grid (no row padding, no M assert).
    x2d = x.reshape(-1, in_dim)
    M = max(x2d.shape[0], 1)

    # Row tile: at most tm_max, and small enough that the grid has >=2 steps
    # whenever M > 8 (so v7x's two TensorCores both get work).
    tm = min(tm_max, _round_up(pl.cdiv(M, 2), 8))
    grid = (pl.cdiv(M, tm),)

    in_specs = [pl.BlockSpec((tm, in_dim), lambda i: (i, 0))]
    for w in weights:
        in_specs.append(pl.BlockSpec(w.shape, lambda i: (0, 0)))
    for b in biases:
        in_specs.append(pl.BlockSpec(b.shape, lambda i: (0, 0)))
    out_spec = pl.BlockSpec((tm, out_dim), lambda i: (i, 0))

    # VMEM budget: double-buffered x/out tiles + (double-buffered) resident
    # weights/biases, plus modest headroom.  Footprint here is a few MiB, so
    # no need to approach v7x's 64 MiB physical VMEM.
    x_item = jnp.dtype(x2d.dtype).itemsize
    vmem_bytes = 2 * (
        tm * in_dim * x_item
        + tm * out_dim * x_item
        + sum(w.size * jnp.dtype(w.dtype).itemsize for w in weights)
        + sum(_round_up(b.shape[1], 128) * 8 * 4 for b in biases))
    vmem_limit = int(min(max(vmem_bytes + (8 << 20), 16 << 20), 48 << 20))

    kernel = functools.partial(_fused_mlp_kernel, num_layers=num_layers,
                               mxu_dtype=mxu_dtype)
    out2d = pl.pallas_call(
        kernel,
        out_shape=jax.ShapeDtypeStruct((x2d.shape[0], out_dim), x.dtype),
        grid_spec=pltpu.PrefetchScalarGridSpec(
            num_scalar_prefetch=0,
            grid=grid,
            in_specs=in_specs,
            out_specs=out_spec,
        ),
        compiler_params=pltpu.CompilerParams(
            dimension_semantics=("parallel",),
            vmem_limit_bytes=vmem_limit),
    )(x2d, *weights, *biases)

    return out2d.reshape(*lead_shape, out_dim)


def init_mlp_params(key, input_dim, hidden_dim, output_dim, num_layers):
    """Deterministic synthetic init matching nn.Linear (stored transposed)."""
    dims_in = [input_dim] + [hidden_dim] * (num_layers - 1)
    dims_out = [hidden_dim] * (num_layers - 1) + [output_dim]
    weights, biases = [], []
    for n_in, n_out in zip(dims_in, dims_out):
        kw, kb, key = jax.random.split(key, 3)
        bound = 1.0 / jnp.sqrt(n_in)
        # torch.nn.Linear default: U(-1/sqrt(fan_in), 1/sqrt(fan_in))
        weights.append(jax.random.uniform(kw, (n_in, n_out), jnp.float32,
                                          -bound, bound))
        biases.append(jax.random.uniform(kb, (n_out,), jnp.float32,
                                         -bound, bound))
    return weights, biases


def _ref_mlp(x, weights, biases):
    num_layers = len(weights)
    h = x.reshape(-1, x.shape[-1]).astype(jnp.float32)
    for i, (w, b) in enumerate(zip(weights, biases)):
        h = h @ w.astype(jnp.float32) + b.astype(jnp.float32).reshape(-1)
        if i < num_layers - 1:
            h = jnp.maximum(h, 0.0)
    return h.reshape(*x.shape[:-1], h.shape[-1])


if __name__ == "__main__":
    # Shapes consistent with the module: MLP(32, 32, 16, num_layers=3),
    # decoder-query layout x = (seq, batch, input_dim).
    input_dim, hidden_dim, output_dim, num_layers = 32, 32, 16, 3
    seq, batch = 8, 2

    key = jax.random.PRNGKey(0)
    kx, kp, kx2 = jax.random.split(key, 3)
    x = jax.random.normal(kx, (seq, batch, input_dim), dtype=jnp.float32)
    weights, biases = init_mlp_params(kp, input_dim, hidden_dim, output_dim,
                                      num_layers)
    ref = _ref_mlp(x, weights, biases)

    # 1) f32 MXU path: exact agreement with the f32 reference.
    w32, b32 = prepare_mlp_params(weights, biases, mxu_dtype=jnp.float32)
    out_f32 = jax.block_until_ready(
        mlp_forward(x, w32, b32, mxu_dtype=jnp.float32))
    assert out_f32.shape == (seq, batch, output_dim)
    assert jnp.allclose(out_f32, ref, atol=1e-5, rtol=1e-5)

    # 2) bf16 MXU path (default / recommended on v5e, v6e, v7x): f32 accum and
    #    f32 epilogue inside the kernel, loose tolerance vs the f32 reference.
    wbf, bbf = prepare_mlp_params(weights, biases, mxu_dtype=jnp.bfloat16)
    out_bf = jax.block_until_ready(
        mlp_forward(x, wbf, bbf, mxu_dtype=jnp.bfloat16))
    assert out_bf.shape == (seq, batch, output_dim)
    assert jnp.allclose(out_bf, ref, atol=5e-2, rtol=5e-2)

    # 3) Ragged-M check: seq*batch not a multiple of the row tile; the partial
    #    last grid block is masked on store (no row padding in the wrapper).
    x2 = jax.random.normal(kx2, (5, 3, input_dim), dtype=jnp.float32)
    out2 = jax.block_until_ready(
        mlp_forward(x2, w32, b32, mxu_dtype=jnp.float32))
    ref2 = _ref_mlp(x2, weights, biases)
    assert out2.shape == (5, 3, output_dim)
    assert jnp.allclose(out2, ref2, atol=1e-5, rtol=1e-5)

    print("KERNEL_OK")
</pallas_src>

<mosaic_0001>
module attributes {stable_mosaic.version = 11 : i64} {
  func.func @_fused_mlp_kernel(%arg0: i32, %arg1: memref<8x32xf32, #tpu.memory_space<vmem>>, %arg2: memref<32x32xf32, #tpu.memory_space<vmem>>, %arg3: memref<32x32xf32, #tpu.memory_space<vmem>>, %arg4: memref<32x16xf32, #tpu.memory_space<vmem>>, %arg5: memref<1x32xf32, #tpu.memory_space<vmem>>, %arg6: memref<1x32xf32, #tpu.memory_space<vmem>>, %arg7: memref<1x16xf32, #tpu.memory_space<vmem>>, %arg8: memref<8x16xf32, #tpu.memory_space<vmem>>) attributes {dimension_semantics = [#tpu.dimension_semantics<parallel>], iteration_bounds = array<i64: 2>, scalar_prefetch = 0 : i64, scratch_operands = 0 : i64, tpu.core_type = #tpu.core_type<tc>, window_params = [{transform_indices = @transform_0, window_bounds = array<i64: 8, 32>}, {pipeline_mode = #tpu.pipeline_mode<synchronous>, transform_indices = @transform_1, window_bounds = array<i64: 32, 32>}, {pipeline_mode = #tpu.pipeline_mode<synchronous>, transform_indices = @transform_2, window_bounds = array<i64: 32, 32>}, {pipeline_mode = #tpu.pipeline_mode<synchronous>, transform_indices = @transform_3, window_bounds = array<i64: 32, 16>}, {pipeline_mode = #tpu.pipeline_mode<synchronous>, transform_indices = @transform_4, window_bounds = array<i64: 1, 32>}, {pipeline_mode = #tpu.pipeline_mode<synchronous>, transform_indices = @transform_5, window_bounds = array<i64: 1, 32>}, {pipeline_mode = #tpu.pipeline_mode<synchronous>, transform_indices = @transform_6, window_bounds = array<i64: 1, 16>}, {transform_indices = @transform_7, window_bounds = array<i64: 8, 16>}]} {
    %c0 = arith.constant 0 : index
    %c0_0 = arith.constant 0 : index
    %0 = vector.load %arg1[%c0, %c0_0] : memref<8x32xf32, #tpu.memory_space<vmem>>, vector<8x32xf32>
    %c0_1 = arith.constant 0 : index
    %c0_2 = arith.constant 0 : index
    %1 = vector.load %arg2[%c0_1, %c0_2] : memref<32x32xf32, #tpu.memory_space<vmem>>, vector<32x32xf32>
    %cst = arith.constant dense<0.000000e+00> : vector<8x32xf32>
    %2 = tpu.matmul %0, %1, %cst {dimension_numbers = #tpu.dot_dimension_numbers<[1], [0], [0], [1], [0, 0, 1, 1], [], []>} : vector<8x32xf32>, vector<32x32xf32>, vector<8x32xf32> -> vector<8x32xf32>
    %c0_3 = arith.constant 0 : index
    %c0_4 = arith.constant 0 : index
    %3 = vector.load %arg5[%c0_3, %c0_4] : memref<1x32xf32, #tpu.memory_space<vmem>>, vector<1x32xf32>
    %4 = vector.broadcast %3 : vector<1x32xf32> to vector<8x32xf32>
    %5 = arith.addf %2, %4 : vector<8x32xf32>
    %cst_5 = arith.constant 0.000000e+00 : f32
    %6 = vector.broadcast %cst_5 : f32 to vector<8x32xf32>
    %7 = arith.maximumf %5, %6 : vector<8x32xf32>
    %c0_6 = arith.constant 0 : index
    %c0_7 = arith.constant 0 : index
    %8 = vector.load %arg3[%c0_6, %c0_7] : memref<32x32xf32, #tpu.memory_space<vmem>>, vector<32x32xf32>
    %cst_8 = arith.constant dense<0.000000e+00> : vector<8x32xf32>
    %9 = tpu.matmul %7, %8, %cst_8 {dimension_numbers = #tpu.dot_dimension_numbers<[1], [0], [0], [1], [0, 0, 1, 1], [], []>} : vector<8x32xf32>, vector<32x32xf32>, vector<8x32xf32> -> vector<8x32xf32>
    %c0_9 = arith.constant 0 : index
    %c0_10 = arith.constant 0 : index
    %10 = vector.load %arg6[%c0_9, %c0_10] : memref<1x32xf32, #tpu.memory_space<vmem>>, vector<1x32xf32>
    %11 = vector.broadcast %10 : vector<1x32xf32> to vector<8x32xf32>
    %12 = arith.addf %9, %11 : vector<8x32xf32>
    %cst_11 = arith.constant 0.000000e+00 : f32
    %13 = vector.broadcast %cst_11 : f32 to vector<8x32xf32>
    %14 = arith.maximumf %12, %13 : vector<8x32xf32>
    %c0_12 = arith.constant 0 : index
    %c0_13 = arith.constant 0 : index
    %15 = vector.load %arg4[%c0_12, %c0_13] : memref<32x16xf32, #tpu.memory_space<vmem>>, vector<32x16xf32>
    %cst_14 = arith.constant dense<0.000000e+00> : vector<8x16xf32>
    %16 = tpu.matmul %14, %15, %cst_14 {dimension_numbers = #tpu.dot_dimension_numbers<[1], [0], [0], [1], [0, 0, 1, 1], [], []>} : vector<8x32xf32>, vector<32x16xf32>, vector<8x16xf32> -> vector<8x16xf32>
    %c0_15 = arith.constant 0 : index
    %c0_16 = arith.constant 0 : index
    %17 = vector.load %arg7[%c0_15, %c0_16] : memref<1x16xf32, #tpu.memory_space<vmem>>, vector<1x16xf32>
    %18 = vector.broadcast %17 : vector<1x16xf32> to vector<8x16xf32>
    %19 = arith.addf %16, %18 : vector<8x16xf32>
    %c0_17 = arith.constant 0 : index
    %c0_18 = arith.constant 0 : index
    %20 = vector.load %arg8[%c0_17, %c0_18] : memref<8x16xf32, #tpu.memory_space<vmem>>, vector<8x16xf32>
    tpu.vector_store %arg8[%c0_17, %c0_18], %19 {strides = array<i32>} : memref<8x16xf32, #tpu.memory_space<vmem>>, vector<8x16xf32>,
    return
  }
  func.func @transform_0(%arg0: i32) -> (i32, i32) {
    %c0_i32 = arith.constant 0 : i32
    %c0_i32_0 = arith.constant 0 : i32
    return %arg0, %c0_i32 : i32, i32
  }
  func.func @transform_1(%arg0: i32) -> (i32, i32) {
    %c0_i32 = arith.constant 0 : i32
    %c0_i32_0 = arith.constant 0 : i32
    %c0_i32_1 = arith.constant 0 : i32
    return %c0_i32, %c0_i32_0 : i32, i32
  }
  func.func @transform_2(%arg0: i32) -> (i32, i32) {
    %c0_i32 = arith.constant 0 : i32
    %c0_i32_0 = arith.constant 0 : i32
    %c0_i32_1 = arith.constant 0 : i32
    return %c0_i32, %c0_i32_0 : i32, i32
  }
  func.func @transform_3(%arg0: i32) -> (i32, i32) {
    %c0_i32 = arith.constant 0 : i32
    %c0_i32_0 = arith.constant 0 : i32
    %c0_i32_1 = arith.constant 0 : i32
    return %c0_i32, %c0_i32_0 : i32, i32
  }
  func.func @transform_4(%arg0: i32) -> (i32, i32) {
    %c0_i32 = arith.constant 0 : i32
    %c0_i32_0 = arith.constant 0 : i32
    %c0_i32_1 = arith.constant 0 : i32
    return %c0_i32, %c0_i32_0 : i32, i32
  }
  func.func @transform_5(%arg0: i32) -> (i32, i32) {
    %c0_i32 = arith.constant 0 : i32
    %c0_i32_0 = arith.constant 0 : i32
    %c0_i32_1 = arith.constant 0 : i32
    return %c0_i32, %c0_i32_0 : i32, i32
  }
  func.func @transform_6(%arg0: i32) -> (i32, i32) {
    %c0_i32 = arith.constant 0 : i32
    %c0_i32_0 = arith.constant 0 : i32
    %c0_i32_1 = arith.constant 0 : i32
    return %c0_i32, %c0_i32_0 : i32, i32
  }
  func.func @transform_7(%arg0: i32) -> (i32, i32) {
    %c0_i32 = arith.constant 0 : i32
    %c0_i32_0 = arith.constant 0 : i32
    return %arg0, %c0_i32 : i32, i32
  }
}

</mosaic_0001>

<bundles_post_ra>
// kernel: tpu_custom_call.1
= control target key start
LH: loop header
LB: loop body
LE: loop exit
PB: predicated region body
PF: predicated region fallthrough
CT: control target
= control target key end

     0   :  { %12 = vsyncpa [#allocation3], 0  ;;  %s1088_s0 = inlined_call_operand.vmem [shape: f32[16,32], index: 0, kind: input, shape index: {}]   ;;  %s1089_s1 = inlined_call_operand.vmem [shape: f32[32,32], index: 1, kind: input, shape index: {}]   ;;  %s1090_s2 = inlined_call_operand.hbm [shape: f32[32,32], index: 2, kind: input, shape index: {}]   ;;  %s1091_s3 = inlined_call_operand.vmem [shape: f32[32,16], index: 3, kind: input, shape index: {}]   ;;  %s1092_s4 = inlined_call_operand.vmem [shape: f32[1,32], index: 4, kind: input, shape index: {}]   ;;  %s1093_s5 = inlined_call_operand.vmem [shape: f32[1,32], index: 5, kind: input, shape index: {}]   ;;  %s1094_s6 = inlined_call_operand.vmem [shape: f32[1,16], index: 6, kind: input, shape index: {}]   ;;  %s1095_s7 = inlined_call_operand.hbm [shape: f32[16,16], index: 7, kind: output, shape index: {}]  }
   0x1   :  { %13 = vsyncpa [#allocation4], 0 }
   0x2   :  { %15 = vsyncpa [#allocation4 + $0x1], 0  ;;  %s914_s24 = smov 0   ;;  %s916_s25 = smov 0  }
   0x3   :  { %s918_s26 = smov 0   ;;  %s920_s27 = smov 0  }
   0x4 LB: > { %s935_s28 = sadd.s32 4294967295, %s865_s27   ;;  %s632_s29 = sadd.s32 4294967294, %s865_s27   ;;  %s865_s27 = sphi %s920_s27, %s1111_s27   ;;  %s861_s26 = sphi %s918_s26, %s1110_s26   ;;  %s857_s25 = sphi %s916_s25, %s1109_s25   ;;  %s853_s24 = sphi %s914_s24, %s1108_s24  }
   0x5   : > { %s939_s30 = sadd.s32 1, %s865_s27   ;;  %s180_s8 = sadd.s32 1, %s861_s26 }
   0x6   : > { %s177_s9 = ssub.s32 %s865_s27, %s939_s30  ;;  %p190_p0 = scmp.ne.s32.totalorder %s861_s26, %s857_s25 }
   0x7   : > { %p178_p1 = scmp.eq.s32.totalorder %s177_s9, 0  ;;  %p191_p2 = scmp.eq.s32.totalorder %s935_s28, 1 }
   0x8   : > { %p196_p3 = scmp.ne.s32.totalorder %s857_s25, %s853_s24  ;;  %p197_p4 = scmp.eq.s32.totalorder %s632_s29, 1 }
   0x9   : > { %s950_s10 = scalar_select %p178_p1, %s861_s26, %s180_s8  }
   0xa   : > { %p952_p5 = por %p191_p2, %p190_p0  ;;  %p956_p6 = por %p197_p4, %p196_p3 }
   0xb   : > { %p633_p7 = scmp.ge.s32.totalorder %s865_s27, 1  ;;  %p204_p8 = scmp.lt.s32.totalorder %s865_s27, 3 }
   0xc   : > { %s1099_s11 = scalar_select %p952_p5, 1, 0 }
   0xd   : > { %s1100_s12 = scalar_select %p956_p6, 1, 0 }
   0xe   : > { %p1096_p9 = scmp.eq.s32.totalorder %s935_s28, 0  ;;  %p963_p10 = pnand %p633_p7, %p204_p8 }
   0xf   : > { %s867_s14 = smov [#allocation2]   ;;  %s771_s19 = scalar_lea.hbm %s1090_s2, 512 }
  0x10   : > { %s1101_s13 = scalar_select %p963_p10, 1, 0 }
  0x11   : > { %s219_s15 = sshll.u32 %s867_s14, 4  ;;  %p722_p11 = pneg %p963_p10  ;;  %s220_s15 = int_to_ptr.vmem [resolvable:$true] %s219_s15 }
  0x12   : > { %p772_p13 = scmp.ne.s32.totalorder %s1090_s2, %s771_s19  ;;  %p778_p3 = scmp.lt.u32.totalorder %s771_s19, %s1090_s2 }
  0x13   : > { %p971_p12 = pnand %p1096_p9, %p722_p11 }
  0x15   : > { %p773_p0 = pneg %p971_p12 }
  0x17   : > { %p774_p1 = pnand %p773_p0, %p772_p13 }
  0x19   : > { %p775_p2 = pneg %p774_p1 }
  0x1b   : > { %p780_p4 = pnand %p778_p3, %p775_p2 }
  0x1d   : > { %783 = shalt.err (!%p780_p4)
}
  0x1e   : > { %s784_s29 = scalar_lea.vmem %s220_s15, 512  ;;  %p792_p9 = scmp.lt.s32.totalorder %s220_s15, %s220_s15 }
  0x1f   : > { %p785_p7 = scmp.ne.s32.totalorder %s220_s15, %s784_s29  ;;  %p793_p6 = scmp.lt.s32.totalorder %s784_s29, %s784_s29 }
  0x21   : > { %p787_p8 = pnand %p785_p7, %p773_p0  ;;  %p794_p5 = por %p793_p6, %p792_p9 }
  0x23   : > { %p788_p11 = pneg %p787_p8 }
  0x25   : > { %p795_p10 = pnand %p794_p5, %p788_p11 }
  0x27   : > { %798 = shalt.err (!%p795_p10)
}
  0x28   : > { %s868_s8 = smov 128   ;;  %s869_s9 = smov 8  }
  0x29   : > { %725 = dma.hbm_to_vmem [thread:$0]  (!%p971_p12), %s1090_s2, 512, %s220_s15, [#allocation3], %s868_s8, %s868_s8, %s869_s9  }
  0x2a   : > { %p1103_p13 = scmp.ne.s32.totalorder %s1101_s13, 0 }
  0x2b   : > { %p1104_p1 = scmp.eq.s32.totalorder (!%p1103_p13), %s935_s28, 0 }
  0x2c   : > { %254 = sbr.rel (%p1103_p13) target bundleno = 722 (0x2d2), region = 48 }
  0x33   : > { %844 = dma.done.wait (%p1104_p1), [#allocation3], 512   ;;  %p1105_p0 = pmov %p1104_p1 }
  0x34   : > { %p285_p5 = scmp.lt.s32.totalorder %s935_s28, 1  ;;  %v870_v0 = vmov 0.0|0.0   ;;  %vm871_vm0 = vmmov 0   ;;  %v872_v1 = vmov 0.0   ;;  %v290_v2 = vld [vmem:[%s1089_s1] sm:$0xff]  ;;  %v291_v3 = vld [vmem:[%s1089_s1 + $0x8] sm:$0xff] }
  0x35   : > { %846 = vsyncadd (%p1105_p0), [#allocation3], 4294966784  ;;  %698 = vmatprep.subr.bf16.mxu0 %v870_v0  ;;  %673 = vmatprep.mubr.msk.f32.mxu0 %vm871_vm0, %v872_v1  ;;  %v292_v4 = vld [vmem:[%s1089_s1 + $0x10] sm:$0xff]  ;;  %v699_v5 = vpack.c.bf16 %v291_v3, %v290_v2  ;;  %v293_v6 = vld [vmem:[%s1089_s1 + $0x18] sm:$0xff]  ;;  %vm301_vm1 = vcmask 261120   ;;  %s282_s9 = sand.u32 1, %s857_s25  }
  0x36   : > { %704 = vmatprep.subr.bf16.mxu1 %v870_v0  ;;  %684 = vmatprep.mubr.msk.f32.mxu1 %vm871_vm0, %v872_v1  ;;  %s286_s13 = scalar_select %p285_p5, %s935_s28, 1  ;;  %v376_v7 = vld [vmem:[#allocation2] sm:$0xff]  ;;  %v377_v8 = vld [vmem:[#allocation2 + $0x8] sm:$0xff]  ;;  %v702_v9 = vpack.c.bf16 %v293_v6, %v292_v4  ;;  %v378_v12 = vld [vmem:[#allocation2 + $0x10] sm:$0xff]  ;;  %vm545_vm2 = vcmask 130048  }
  0x37   : > { %700 = vmatpush3.bf16.msra.mxu0 %v699_v5  ;;  %v705_v10 = vpack.c.bf16 %v377_v8, %v376_v7  ;;  %v379_v13 = vld [vmem:[#allocation2 + $0x18] sm:$0xff]  ;;  %v461_v15 = vld [vmem:[%s1091_s3] sm:$0xff]  ;;  %v462_v16 = vld [vmem:[%s1091_s3 + $0x8] sm:$0xff]  ;;  %s647_s15 = sshll.u32 %s935_s28, 7  ;;  %s548_s22 = scalar_lea.sflag [#allocation4], %s282_s9 }
  0x38   : > { %s639_s29 = sshll.u32 %s286_s13, 3  ;;  %701 = vmatprep.subr.bf16.mxu0 %v870_v0  ;;  %v708_v14 = vpack.c.bf16 %v379_v13, %v378_v12  ;;  %v711_v17 = vpack.c.bf16 %v462_v16, %v461_v15  ;;  %v640_v18 = vld [vmem:[%s1092_s4] ss:$0 sm:$0xff]  ;;  %v463_v23 = vld [vmem:[%s1091_s3 + $0x10] sm:$0xff]  ;;  %v464_v24 = vld [vmem:[%s1091_s3 + $0x18] sm:$0xff]  ;;  %s1046_s21 = scalar_lea.hbm %s1095_s7, %s647_s15 }
  0x39   : > { %s288_s14 = scalar_lea.vmem %s1088_s0, %s639_s29  ;;  %706 = vmatpush3.bf16.msra.mxu1 %v705_v10  ;;  %v714_v25 = vpack.c.bf16 %v464_v24, %v463_v23  ;;  %v642_v26 = vld [vmem:[%s1093_s5] ss:$0 sm:$0xff]  ;;  %p1106_p9 = scmp.ne.s32.totalorder %s1099_s11, 0 }
  0x3a   : > { %707 = vmatprep.subr.bf16.mxu1 %v870_v0  ;;  %v289_v11 = vld [vmem:[%s288_s14] sm:$0xff]  ;;  %s638_s14 = sshll.u32 %s282_s9, 3  ;;  %s873_s28 = smov [#allocation5]  }
  0x3b   : > { %703 = vmatpush3.bf16.msra.mxu0 %v702_v9  ;;  %v644_v31 = vld [vmem:[%s1094_s6] ss:$0 sm:$0xff]  ;;  %s284_s16 = scalar_lea.vmem [#allocation5], %s638_s14  ;;  %s803_s29 = sshll.u32 %s873_s28, 4  ;;  %s804_s29 = int_to_ptr.vmem [resolvable:$false] %s803_s29 }
  0x3c   : > { %710 = vmatprep.subr.bf16.mxu0 %v870_v0  ;;  %s561_s18 = sshll.u32 %s284_s16, 4  ;;  %s805_s8 = scalar_lea.vmem %s804_s29, 256  ;;  %s1048_s18 = int_to_ptr.vmem [resolvable:$true] %s561_s18 }
  0x3d   : > { %709 = vmatpush3.bf16.msra.mxu1 %v708_v14  ;;  %s799_s23 = scalar_lea.vmem %s1048_s18, 128  ;;  %p806_p2 = scmp.lt.s32.totalorder %s1048_s18, %s804_s29 }
  0x3e   : > { %674 = vmatmul.mubr.msk.f32.vlgmr.msra.gmra.mrb[0].mxu0 %vm301_vm1, %v289_v11  ;;  %p800_p6 = scmp.ne.s32.totalorder %s1048_s18, %s799_s23  ;;  %p807_p3 = scmp.lt.s32.totalorder %s805_s8, %s799_s23 }
  0x3f   : > { %695 = vmatprep.mubr.msk.f32.mxu0 %vm871_vm0, %v872_v1  ;;  %712 = vmatpush3.bf16.msra.mxu0 %v711_v17 }
  0x40   : > { %713 = vmatprep.subr.bf16.mxu0 %v870_v0  ;;  %p801_p10 = pnand %p800_p6, %p1106_p9  ;;  %p808_p4 = por %p807_p3, %p806_p2 }
  0x42   : > { %p802_p12 = pneg %p801_p10 }
  0x43   : > { %715 = vmatpush3.bf16.msra.mxu0 %v714_v25 }
  0x44   : > { %p809_p7 = pnand %p808_p4, %p802_p12 }
 0x111   : > { %v371_v19 = vpop.f32.mrb[0].mxu0 }
 0x112   : > { %v372_v20 = vadd.f32 %v640_v18, %v371_v19  ;;  %v675_v21 = vpop.f32.mrb[1].mxu0 }
 0x114   : > { %v375_v22 = vmax.f32 %v372_v20, 0.0 }
 0x116   : > { %685 = vmatmul.mubr.msk.f32.vlgmr.msra.gmra.mrb[0].mxu1 %vm301_vm1, %v375_v22 }
 0x1e9   : > { %v456_v27 = vpop.f32.mrb[0].mxu1 }
 0x1ea   : > { %v457_v28 = vadd.f32 %v642_v26, %v456_v27  ;;  %v686_v29 = vpop.f32.mrb[1].mxu1 }
 0x1ec   : > { %v460_v30 = vmax.f32 %v457_v28, 0.0 }
 0x1ee   : > { %696 = vmatmul.mubr.msk.f32.vlgmr.msra.gmra.mrb[2].mxu0 %vm301_vm1, %v460_v30 }
 0x2c1   : > { %v541_v32 = vpop.f32.mrb[2].mxu0 }
 0x2c2   : > { %v542_v33 = vadd.f32 %v644_v31, %v541_v32  ;;  %v697_v34 = vpop.f32.mrb[3].mxu0 }
 0x2c4   : > { %546 = vst.msk [vmem:[%s284_s16] sm:$0xff] %vm545_vm2, %v542_v33 }
 0x2c5   : > { %812 = shalt.err (!%p809_p7)
}
 0x2c6   : > { %s813_s9 = scalar_lea.hbm %s1046_s21, 128  ;;  %s817_s13 = scalar_lea.hbm %s1095_s7, 256 }
 0x2c7   : > { %p814_p8 = scmp.ne.s32.totalorder %s1046_s21, %s813_s9  ;;  %p818_p1 = scmp.lt.u32.totalorder %s1046_s21, %s1095_s7 }
 0x2c8   : > { %p819_p0 = scmp.lt.u32.totalorder %s817_s13, %s813_s9  ;;  %p821_p6 = scmp.lt.u32.totalorder %s813_s9, %s1046_s21 }
 0x2c9   : > { %p815_p11 = pnand %p814_p8, %p1106_p9 }
 0x2ca   : > { %p820_p5 = por %p819_p0, %p818_p1 }
 0x2cb   : > { %p816_p13 = pneg %p815_p11 }
 0x2cc   : > { %p822_p10 = por %p821_p6, %p820_p5 }
 0x2ce   : > { %p823_p12 = pnand %p822_p10, %p816_p13 }
 0x2d0   : > { %826 = shalt.err (!%p823_p12)
}
 0x2d1   : > { %720 = dma.vmem_to_hbm [thread:$0]  (%p1106_p9), %s1048_s18, 128, %s1046_s21, %s548_s22  }
 0x2d2 PF: > { %p732_p2 = scmp.ge.s32.totalorder %s865_s27, 2  ;;  %s573_s19 = sand.u32 1, %s853_s24  }
 0x2d3   : > { %p1107_p3 = scmp.ne.s32.totalorder %s1100_s12, 0  ;;  %s574_s20 = scalar_lea.sflag [#allocation4], %s573_s19 }
 0x2d5   : > { %p727_p4 = pnand %p732_p2, %p1107_p3 }
 0x2d7   : > { %848 = dma.done.wait (!%p727_p4), %s574_s20, 128  }
 0x2d8   : > { %850 = vsyncadd (!%p727_p4), %s574_s20, 4294967168  ;;  %p18_p7 = scmp.ge.s32.totalorder %s939_s30, 4   ;;  %s1108_s24 = smov %s857_s25 }
 0x2d9   : > { %s1109_s25 = smov %s861_s26  ;;  %s1110_s26 = smov %s950_s10 }
 0x2da   : > { %s1111_s27 = smov %s939_s30  ;;  %20 = sbr.rel (!%p18_p7) target bundleno = 4 (0x4), region = 88 }
 0x2e1   :  { %579 = vsyncpa [#allocation3], 1 }
 0x2e2   :  { %581 = vsyncpa [#allocation3 + $0x1], 1 }
 0x2e3   :  { %582 = vsyncpa [#allocation4], 1 }
 0x2e4   :  { %584 = vsyncpa [#allocation4 + $0x1], 1 }

</bundles_post_ra>
